<compile_context>
chip_gen: v7x
topology: tpu7x:2x2x1
jax: 0.10.0
libtpu: 0.0.40
codegen_flags: <defaults>
</compile_context>

<pallas_src>
import functools

import jax
import jax.numpy as jnp
from jax.experimental import pallas as pl
from jax.experimental.pallas import tpu as pltpu


def _align(v: int, m: int) -> int:
    return ((v + m - 1) // m) * m


def _min_sublane(dtype) -> int:
    # Minimum second-minor tile: 8 rows (f32), 16 (bf16/fp16), 32 (int8/fp8).
    return {4: 8, 2: 16, 1: 32}.get(jnp.dtype(dtype).itemsize, 8)


# --------------------------------------------------------------------------
# Kernels
# --------------------------------------------------------------------------
def _linear_acti_kernel_f32(x_ref, w_ref, b_ref, o_ref):
    # x_ref: (tm, tk), w_ref: (tk, tn), b_ref: (1, tn), o_ref: (tm, tn) f32.
    # The output block is resident across the K grid axis -> accumulate in it.
    k = pl.program_id(2)
    part = jnp.dot(x_ref[...], w_ref[...], preferred_element_type=jnp.float32)

    @pl.when(k == 0)
    def _():
        o_ref[...] = part

    @pl.when(k > 0)
    def _():
        o_ref[...] += part

    @pl.when(k == pl.num_programs(2) - 1)
    def _():
        # Fused bias + ReLU epilogue, once per (i, j) tile.
        o_ref[...] = jnp.maximum(o_ref[...] + b_ref[...], 0.0)


def _linear_acti_kernel_acc(x_ref, w_ref, b_ref, o_ref, acc_ref):
    # Variant with a float32 VMEM accumulator for non-f32 output dtypes.
    k = pl.program_id(2)
    part = jnp.dot(x_ref[...], w_ref[...], preferred_element_type=jnp.float32)

    @pl.when(k == 0)
    def _():
        acc_ref[...] = part

    @pl.when(k > 0)
    def _():
        acc_ref[...] += part

    @pl.when(k == pl.num_programs(2) - 1)
    def _():
        y = acc_ref[...] + b_ref[...].astype(jnp.float32)
        o_ref[...] = jnp.maximum(y, 0.0).astype(o_ref.dtype)


# --------------------------------------------------------------------------
# Jitted per-call wrapper (weight already transposed + padded outside)
# --------------------------------------------------------------------------
@functools.partial(jax.jit, static_argnames=("out_f", "tm", "tn", "tk"))
def _linear_acti_call(x, w_t, b2d, *, out_f: int, tm: int, tn: int, tk: int):
    B, in_f = x.shape
    Kp, Np = w_t.shape                       # already tile-aligned
    Mp = _align(B, tm)

    # Pad activations only when actually needed (static guard).
    if Mp != B or Kp != in_f:
        x = jnp.pad(x, ((0, Mp - B), (0, Kp - in_f)))

    grid = (Mp // tm, Np // tn, Kp // tk)

    out_dtype = x.dtype
    itemsize = jnp.dtype(out_dtype).itemsize
    cost = pl.CostEstimate(
        flops=2 * Mp * Np * Kp,
        transcendentals=0,
        bytes_accessed=(Mp * Kp + Kp * Np + Np) * itemsize + Mp * Np * itemsize,
    )

    if out_dtype == jnp.float32:
        kernel = _linear_acti_kernel_f32
        scratch_shapes = []
    else:
        kernel = _linear_acti_kernel_acc
        scratch_shapes = [pltpu.VMEM((tm, tn), jnp.float32)]

    out_p = pl.pallas_call(
        kernel,
        out_shape=jax.ShapeDtypeStruct((Mp, Np), out_dtype),
        grid_spec=pltpu.PrefetchScalarGridSpec(
            num_scalar_prefetch=0,
            grid=grid,
            in_specs=[
                pl.BlockSpec((tm, tk), lambda i, j, k: (i, k)),  # x tile
                pl.BlockSpec((tk, tn), lambda i, j, k: (k, j)),  # W^T tile
                pl.BlockSpec((1, tn), lambda i, j, k: (0, j)),   # bias tile
            ],
            out_specs=pl.BlockSpec((tm, tn), lambda i, j, k: (i, j)),
            scratch_shapes=scratch_shapes,
        ),
        compiler_params=pltpu.CompilerParams(
            # M/N shard across TensorCores; K is the sequential reduction.
            dimension_semantics=("parallel", "parallel", "arbitrary"),
        ),
        cost_estimate=cost,
    )(x, w_t, b2d)

    if Mp != B or Np != out_f:
        out_p = out_p[:B, :out_f]
    return out_p


# --------------------------------------------------------------------------
# One-time parameter preparation + user-facing factory
# --------------------------------------------------------------------------
def _choose_nk_tiles(in_f: int, out_f: int, *, batch_hint=None, tn=None, tk=None):
    # Keep N/K tiles 256-aligned for the 256x256 MXU on v6e/v7x when the layer
    # is big enough; fall back to 128 alignment for small layers.
    if tk is None:
        tk = min(512, _align(in_f, 256) if in_f >= 256 else _align(in_f, 128))
    if tn is None:
        tn = min(512, _align(out_f, 256) if out_f >= 256 else _align(out_f, 128))
        # Small-batch / wide-layer: make sure the parallel M*N grid has >= 2
        # tiles so both v7x TensorCores get work.
        if batch_hint is not None and batch_hint <= 256 and out_f >= 2 * tn:
            pass  # already >= 2 N tiles
        elif batch_hint is not None and batch_hint <= 256 and out_f > 256:
            tn = min(tn, max(256, _align((out_f + 1) // 2, 256)))
    return tn, tk


def make_linear_acti(weight, bias, *, batch_hint=None, tm=None, tn=None, tk=None):
    """Build a callable x -> ReLU(x @ weight.T + bias).

    weight: (out_f, in_f)  (PyTorch nn.Linear convention)
    bias:   (out_f,)

    The weight transpose and all weight/bias padding happen exactly once here
    (parameter-load time), not on every forward call.
    """
    out_f, in_f = weight.shape
    tn, tk = _choose_nk_tiles(in_f, out_f, batch_hint=batch_hint, tn=tn, tk=tk)
    Np = _align(out_f, tn)
    Kp = _align(in_f, tk)

    w_t = weight.T  # (in_f, out_f) -> lane-dense (K, N)
    if Kp != in_f or Np != out_f:
        w_t = jnp.pad(w_t, ((0, Kp - in_f), (0, Np - out_f)))
    b = bias if Np == out_f else jnp.pad(bias, (0, Np - out_f))
    b2d = b.reshape(1, Np)

    # Materialize the prepared parameters on device once.
    w_t = jax.block_until_ready(w_t)
    b2d = jax.block_until_ready(b2d)

    tm_user = tm

    def apply(x):
        B = x.shape[0]
        sub = _min_sublane(x.dtype)
        tm_eff = tm_user if tm_user is not None else min(256, _align(B, sub))
        return _linear_acti_call(x, w_t, b2d, out_f=out_f, tm=tm_eff, tn=tn, tk=tk)

    return apply


def linear_acti(x, weight, bias):
    """One-shot convenience wrapper (prepares the weight on every call; prefer
    make_linear_acti for repeated use)."""
    return make_linear_acti(weight, bias, batch_hint=x.shape[0])(x)


if __name__ == "__main__":
    key = jax.random.PRNGKey(0)
    kx, kw, kb = jax.random.split(key, 3)

    batch = 8
    in_features = 32
    out_features = 64

    # Deterministic parameter init (mimics nn.Linear uniform(-1/sqrt(in), 1/sqrt(in)))
    bound = 1.0 / (in_features ** 0.5)
    weight = jax.random.uniform(kw, (out_features, in_features),
                                minval=-bound, maxval=bound, dtype=jnp.float32)
    bias = jax.random.uniform(kb, (out_features,),
                              minval=-bound, maxval=bound, dtype=jnp.float32)

    x = jax.random.normal(kx, (batch, in_features), dtype=jnp.float32)

    # Prepare once, then call (weight transpose/pad not in the per-call path).
    layer = make_linear_acti(weight, bias, batch_hint=batch)
    out = layer(x)
    out = jax.block_until_ready(out)

    # Reference check in plain JAX
    ref = jnp.maximum(x @ weight.T + bias, 0.0)
    assert out.shape == (batch, out_features)
    assert jnp.allclose(out, ref, atol=1e-5, rtol=1e-5)

    print("KERNEL_OK")
</pallas_src>

<mosaic_0001>
module attributes {stable_mosaic.version = 11 : i64} {
  func.func @_linear_acti_kernel_f32(%arg0: i32, %arg1: i32, %arg2: i32, %arg3: memref<8x128xf32, #tpu.memory_space<vmem>>, %arg4: memref<128x128xf32, #tpu.memory_space<vmem>>, %arg5: memref<1x128xf32, #tpu.memory_space<vmem>>, %arg6: memref<8x128xf32, #tpu.memory_space<vmem>>) attributes {dimension_semantics = [#tpu.dimension_semantics<parallel>, #tpu.dimension_semantics<parallel>, #tpu.dimension_semantics<arbitrary>], iteration_bounds = array<i64: 1, 1, 1>, scalar_prefetch = 0 : i64, scratch_operands = 0 : i64, tpu.core_type = #tpu.core_type<tc>, window_params = [{transform_indices = @transform_0, window_bounds = array<i64: 8, 128>}, {transform_indices = @transform_1, window_bounds = array<i64: 128, 128>}, {transform_indices = @transform_2, window_bounds = array<i64: 1, 128>}, {transform_indices = @transform_3, window_bounds = array<i64: 8, 128>}]} {
    %c0 = arith.constant 0 : index
    %c0_0 = arith.constant 0 : index
    %0 = vector.load %arg3[%c0, %c0_0] : memref<8x128xf32, #tpu.memory_space<vmem>>, vector<8x128xf32>
    %c0_1 = arith.constant 0 : index
    %c0_2 = arith.constant 0 : index
    %1 = vector.load %arg4[%c0_1, %c0_2] : memref<128x128xf32, #tpu.memory_space<vmem>>, vector<128x128xf32>
    %cst = arith.constant dense<0.000000e+00> : vector<8x128xf32>
    %2 = tpu.matmul %0, %1, %cst {dimension_numbers = #tpu.dot_dimension_numbers<[1], [0], [0], [1], [0, 0, 1, 1], [], []>} : vector<8x128xf32>, vector<128x128xf32>, vector<8x128xf32> -> vector<8x128xf32>
    %c0_i32 = arith.constant 0 : i32
    %3 = arith.cmpi eq, %arg2, %c0_i32 : i32
    %4 = arith.extui %3 : i1 to i32
    %c0_i32_3 = arith.constant 0 : i32
    %5 = arith.cmpi ne, %4, %c0_i32_3 : i32
    scf.if %5 {
      %c0_8 = arith.constant 0 : index
      %c0_9 = arith.constant 0 : index
      %12 = vector.load %arg6[%c0_8, %c0_9] : memref<8x128xf32, #tpu.memory_space<vmem>>, vector<8x128xf32>
      tpu.vector_store %arg6[%c0_8, %c0_9], %2 {strides = array<i32>} : memref<8x128xf32, #tpu.memory_space<vmem>>, vector<8x128xf32>,
    } else {
    }
    %c0_i32_4 = arith.constant 0 : i32
    %6 = arith.cmpi sgt, %arg2, %c0_i32_4 : i32
    %7 = arith.extui %6 : i1 to i32
    %c0_i32_5 = arith.constant 0 : i32
    %8 = arith.cmpi ne, %7, %c0_i32_5 : i32
    scf.if %8 {
      %c0_8 = arith.constant 0 : index
      %c0_9 = arith.constant 0 : index
      %12 = vector.load %arg6[%c0_8, %c0_9] : memref<8x128xf32, #tpu.memory_space<vmem>>, vector<8x128xf32>
      %13 = arith.addf %12, %2 : vector<8x128xf32>
      %c0_10 = arith.constant 0 : index
      %c0_11 = arith.constant 0 : index
      %14 = vector.load %arg6[%c0_10, %c0_11] : memref<8x128xf32, #tpu.memory_space<vmem>>, vector<8x128xf32>
      tpu.vector_store %arg6[%c0_10, %c0_11], %13 {strides = array<i32>} : memref<8x128xf32, #tpu.memory_space<vmem>>, vector<8x128xf32>,
    } else {
    }
    %c0_i32_6 = arith.constant 0 : i32
    %9 = arith.cmpi eq, %arg2, %c0_i32_6 : i32
    %10 = arith.extui %9 : i1 to i32
    %c0_i32_7 = arith.constant 0 : i32
    %11 = arith.cmpi ne, %10, %c0_i32_7 : i32
    scf.if %11 {
      %c0_8 = arith.constant 0 : index
      %c0_9 = arith.constant 0 : index
      %12 = vector.load %arg6[%c0_8, %c0_9] : memref<8x128xf32, #tpu.memory_space<vmem>>, vector<8x128xf32>
      %c0_10 = arith.constant 0 : index
      %c0_11 = arith.constant 0 : index
      %13 = vector.load %arg5[%c0_10, %c0_11] : memref<1x128xf32, #tpu.memory_space<vmem>>, vector<1x128xf32>
      %14 = vector.broadcast %13 : vector<1x128xf32> to vector<8x128xf32>
      %15 = arith.addf %12, %14 : vector<8x128xf32>
      %cst_12 = arith.constant 0.000000e+00 : f32
      %16 = vector.broadcast %cst_12 : f32 to vector<8x128xf32>
      %17 = arith.maximumf %15, %16 : vector<8x128xf32>
      %c0_13 = arith.constant 0 : index
      %c0_14 = arith.constant 0 : index
      %18 = vector.load %arg6[%c0_13, %c0_14] : memref<8x128xf32, #tpu.memory_space<vmem>>, vector<8x128xf32>
      tpu.vector_store %arg6[%c0_13, %c0_14], %17 {strides = array<i32>} : memref<8x128xf32, #tpu.memory_space<vmem>>, vector<8x128xf32>,
    } else {
    }
    return
  }
  func.func @transform_0(%arg0: i32, %arg1: i32, %arg2: i32) -> (i32, i32) {
    %c0_i32 = arith.constant 0 : i32
    return %arg0, %arg2 : i32, i32
  }
  func.func @transform_1(%arg0: i32, %arg1: i32, %arg2: i32) -> (i32, i32) {
    %c0_i32 = arith.constant 0 : i32
    return %arg2, %arg1 : i32, i32
  }
  func.func @transform_2(%arg0: i32, %arg1: i32, %arg2: i32) -> (i32, i32) {
    %c0_i32 = arith.constant 0 : i32
    %c0_i32_0 = arith.constant 0 : i32
    return %c0_i32, %arg1 : i32, i32
  }
  func.func @transform_3(%arg0: i32, %arg1: i32, %arg2: i32) -> (i32, i32) {
    %c0_i32 = arith.constant 0 : i32
    return %arg0, %arg1 : i32, i32
  }
}

</mosaic_0001>

<bundles_post_ra>
// kernel: _linear_acti_call.1
= control target key start
LH: loop header
LB: loop body
LE: loop exit
PB: predicated region body
PF: predicated region fallthrough
CT: control target
= control target key end

     0   :  { %8 = vsyncpa [#allocation3], 0  ;;  %s346_s0 = inlined_call_operand.vmem [shape: f32[8,128], index: 0, kind: input, shape index: {}]   ;;  %s347_s1 = inlined_call_operand.hbm [shape: f32[128,128], index: 1, kind: input, shape index: {}]   ;;  %s348_s2 = inlined_call_operand.vmem [shape: f32[1,128], index: 2, kind: input, shape index: {}]   ;;  %s349_s3 = inlined_call_operand.hbm [shape: f32[8,128], index: 3, kind: output, shape index: {}]  }
   0x1   :  { %9 = vsyncpa [#allocation4], 0  ;;  %s289_s12 = smov [#allocation2]   ;;  %s241_s16 = scalar_lea.hbm %s347_s1, 2048 }
   0x2   :  { %s17_s13 = sshll.u32 %s289_s12, 4  ;;  %p242_p0 = scmp.ne.s32.totalorder %s347_s1, %s241_s16  ;;  %s18_s13 = int_to_ptr.vmem [resolvable:$true] %s17_s13 }
   0x3   :  { %p245_p1 = scmp.lt.u32.totalorder %s241_s16, %s347_s1 }
   0x5   :  { %p247_p2 = pnand %p245_p1, %p242_p0 }
   0x7   :  { %250 = shalt.err (!%p247_p2)
}
   0x8   :  { %s251_s21 = scalar_lea.vmem %s18_s13, 2048  ;;  %p256_p4 = scmp.lt.s32.totalorder %s18_s13, %s18_s13 }
   0x9   :  { %p252_p3 = scmp.ne.s32.totalorder %s18_s13, %s251_s21  ;;  %p257_p5 = scmp.lt.s32.totalorder %s251_s21, %s251_s21 }
   0xb   :  { %p258_p6 = por %p257_p5, %p256_p4 }
   0xd   :  { %p259_p7 = pnand %p258_p6, %p252_p3 }
   0xf   :  { %262 = shalt.err (!%p259_p7)
}
  0x10   :  { %s290_s22 = smov 128   ;;  %s291_s23 = smov 8  }
  0x11   :  { %23 = dma.hbm_to_vmem [thread:$0]  %s347_s1, 2048, %s18_s13, [#allocation3], %s290_s22, %s290_s22, %s291_s23  }
  0x12   :  { %285 = dma.done.wait [#allocation3], 2048  }
  0x13   :  { %286 = vsyncadd [#allocation3], 4294965248  ;;  %v292_v0 = vmov 0.0|0.0   ;;  %vm293_vm0 = vmmov 0   ;;  %v294_v1 = vmov 0.0   ;;  %v30_v2 = vld [vmem:[#allocation2] sm:$0xff] }
  0x14   :  { %210 = vmatprep.subr.bf16.mxu0 %v292_v0  ;;  %207 = vmatprep.mubr.msk.f32.mxu0 %vm293_vm0, %v294_v1  ;;  %v31_v3 = vld [vmem:[#allocation2 + $0x8] sm:$0xff]  ;;  %v32_v4 = vld [vmem:[#allocation2 + $0x10] sm:$0xff]  ;;  %v33_v6 = vld [vmem:[#allocation2 + $0x18] sm:$0xff]  ;;  %s295_s29 = smov [#allocation5]  }
  0x15   :  { %v211_v5 = vpack.c.bf16 %v31_v3, %v30_v2  ;;  %v214_v7 = vpack.c.bf16 %v33_v6, %v32_v4  ;;  %v34_v8 = vld [vmem:[#allocation2 + $0x20] sm:$0xff]  ;;  %v35_v9 = vld [vmem:[#allocation2 + $0x28] sm:$0xff]  ;;  %v36_v11 = vld [vmem:[#allocation2 + $0x30] sm:$0xff]  ;;  %s148_s30 = sshll.u32 %s295_s29, 4  ;;  %s149_s30 = int_to_ptr.vmem [resolvable:$true] %s148_s30 }
  0x16   :  { %v217_v10 = vpack.c.bf16 %v35_v9, %v34_v8  ;;  %v37_v12 = vld [vmem:[#allocation2 + $0x38] sm:$0xff]  ;;  %v38_v14 = vld [vmem:[#allocation2 + $0x40] sm:$0xff]  ;;  %v39_v15 = vld [vmem:[#allocation2 + $0x48] sm:$0xff]  ;;  %s263_s4 = scalar_lea.vmem %s149_s30, 128  ;;  %p268_p9 = scmp.lt.s32.totalorder %s149_s30, %s149_s30 }
  0x17   :  { %212 = vmatpush3.bf16.msra.mxu0 %v211_v5  ;;  %v220_v13 = vpack.c.bf16 %v37_v12, %v36_v11  ;;  %v223_v16 = vpack.c.bf16 %v39_v15, %v38_v14  ;;  %v40_v17 = vld [vmem:[#allocation2 + $0x50] sm:$0xff]  ;;  %v41_v18 = vld [vmem:[#allocation2 + $0x58] sm:$0xff]  ;;  %v42_v20 = vld [vmem:[#allocation2 + $0x60] sm:$0xff]  ;;  %p264_p8 = scmp.ne.s32.totalorder %s149_s30, %s263_s4  ;;  %p269_p10 = scmp.lt.s32.totalorder %s263_s4, %s263_s4 }
  0x18   :  { %213 = vmatprep.subr.bf16.mxu0 %v292_v0  ;;  %v226_v19 = vpack.c.bf16 %v41_v18, %v40_v17  ;;  %v43_v21 = vld [vmem:[#allocation2 + $0x68] sm:$0xff]  ;;  %v44_v23 = vld [vmem:[#allocation2 + $0x70] sm:$0xff]  ;;  %v45_v24 = vld [vmem:[#allocation2 + $0x78] sm:$0xff] }
  0x19   :  { %v229_v22 = vpack.c.bf16 %v43_v21, %v42_v20  ;;  %v232_v25 = vpack.c.bf16 %v45_v24, %v44_v23  ;;  %v29_v26 = vld [vmem:[%s346_s0] sm:$0xff]  ;;  %p270_p11 = por %p269_p10, %p268_p9 }
  0x1a   :  { %v157_v27 = vld [vmem:[%s348_s2] ss:$0 sm:$0xff] }
  0x1b   :  { %215 = vmatpush3.bf16.msra.mxu0 %v214_v7  ;;  %p271_p12 = pnand %p270_p11, %p264_p8 }
  0x1c   :  { %216 = vmatprep.subr.bf16.mxu0 %v292_v0 }
  0x1f   :  { %218 = vmatpush3.bf16.msra.mxu0 %v217_v10 }
  0x20   :  { %219 = vmatprep.subr.bf16.mxu0 %v292_v0 }
  0x23   :  { %221 = vmatpush3.bf16.msra.mxu0 %v220_v13 }
  0x24   :  { %222 = vmatprep.subr.bf16.mxu0 %v292_v0 }
  0x27   :  { %224 = vmatpush3.bf16.msra.mxu0 %v223_v16 }
  0x28   :  { %225 = vmatprep.subr.bf16.mxu0 %v292_v0 }
  0x2b   :  { %227 = vmatpush3.bf16.msra.mxu0 %v226_v19 }
  0x2c   :  { %228 = vmatprep.subr.bf16.mxu0 %v292_v0 }
  0x2f   :  { %230 = vmatpush3.bf16.msra.mxu0 %v229_v22 }
  0x30   :  { %231 = vmatprep.subr.bf16.mxu0 %v292_v0 }
  0x33   :  { %233 = vmatpush3.bf16.msra.mxu0 %v232_v25 }
  0x36   :  { %208 = vmatmul.mubr.f32.vlgmr.msra.gmra.mrb[0].mxu0 %v29_v26 }
 0x109   :  { %v112_v28 = vpop.f32.mrb[0].mxu0 }
 0x10a   :  { %v209_v29 = vpop.f32.mrb[1].mxu0  ;;  %v139_v30 = vadd.f32 %v157_v27, %v112_v28 }
 0x10c   :  { %v140_v31 = vmax.f32 %v139_v30, 0.0 }
 0x10e   :  { %141 = vst [vmem:[#allocation5] sm:$0xff] %v140_v31 }
 0x10f   :  { %274 = shalt.err (!%p271_p12)
}
 0x110   :  { %s275_s6 = scalar_lea.hbm %s349_s3, 128 }
 0x111   :  { %p276_p13 = scmp.ne.s32.totalorder %s349_s3, %s275_s6  ;;  %p279_p0 = scmp.lt.u32.totalorder %s275_s6, %s349_s3 }
 0x113   :  { %p281_p1 = pnand %p279_p0, %p276_p13 }
 0x115   :  { %284 = shalt.err (!%p281_p1)
}
 0x116   :  { %151 = dma.vmem_to_hbm [thread:$0]  %s149_s30, 128, %s349_s3, [#allocation4]  }
 0x117   :  { %287 = dma.done.wait [#allocation4], 128  }
 0x118   :  { %288 = vsyncadd [#allocation4], 4294967168 }
 0x119   :  { %155 = vsyncpa [#allocation3], 1 }
 0x11a   :  { %156 = vsyncpa [#allocation4], 1 }

</bundles_post_ra>
